<compile_context>
chip_gen: v6e
topology: v6e:2x2x1
jax: 0.10.0
libtpu: 0.0.40
codegen_flags: <defaults>
</compile_context>

<pallas_src>
import numpy as np
import jax
import jax.numpy as jnp
from jax import lax
from jax.experimental import pallas as pl
from jax.experimental.pallas import tpu as pltpu


def _round_up(x, m):
    return (x + m - 1) // m * m


def _device_generation():
    try:
        kind = jax.devices()[0].device_kind.lower()
    except Exception:
        return "unknown"
    if "v5" in kind and ("lite" in kind or "v5e" in kind):
        return "v5e"
    if "v6" in kind:
        return "v6e"
    if "v7" in kind:
        return "v7x"
    return "unknown"


# Per-generation (max padded vocab for the VMEM-resident one-hot path, vmem_limit_bytes).
#  - v5e: slower MXU -> smaller onehot/gather crossover, but 128 MiB physical VMEM.
#  - v6e: fast MXU + 128 MiB physical VMEM -> widen the resident fast path.
#  - v7x: 64 MiB physical VMEM and the table is duplicated per TensorCore -> conservative.
_GEN_PARAMS = {
    "v5e":     (4096,  64 * 1024 * 1024),
    "v6e":     (16384, 64 * 1024 * 1024),
    "v7x":     (8192,  None),
    "unknown": (8192,  None),
}


# ----------------------------------------------------------------------------- #
# Path A: small vocab — VMEM-resident bf16-plane table, one-hot gather on the MXU.
# ----------------------------------------------------------------------------- #
def _onehot_kernel(idx_ref, planes_ref, out_ref):
    # idx_ref:    (TM, 1) int32 row indices for this chunk
    # planes_ref: (V_pad, 3*D) bf16 [hi | mid | lo] planes; constant index_map so
    #             the block is DMA'd into VMEM once and reused by every chunk.
    # out_ref:    (TM, D) output block; D equals the full array dim, so the HBM
    #             writeback is exactly TM*D useful elements (no write amplification).
    idx = idx_ref[...]
    tm = idx.shape[0]
    v_pad = planes_ref.shape[0]
    d = out_ref.shape[1]
    # bf16 one-hot selector (0/1 exact in bf16) -> one default-precision bf16 MXU
    # matmul against the 3 concatenated planes (no multi-pass f32 HIGHEST emulation).
    one_hot = (idx == lax.broadcasted_iota(jnp.int32, (tm, v_pad), 1)).astype(planes_ref.dtype)
    r = jnp.dot(one_hot, planes_ref[...], preferred_element_type=jnp.float32)  # (TM, 3D) f32
    # Exact f32 row reconstruction: hi + mid + lo (each plane was selected exactly).
    out_ref[...] = (r[:, :d] + r[:, d:2 * d] + r[:, 2 * d:]).astype(out_ref.dtype)


def _split_bf16_planes(weight):
    """Split an f32 table into 3 bf16 planes whose sum reproduces it to ~2^-26 rel."""
    w = weight.astype(jnp.float32)
    p0 = w.astype(jnp.bfloat16)
    r1 = w - p0.astype(jnp.float32)
    p1 = r1.astype(jnp.bfloat16)
    r2 = r1 - p1.astype(jnp.float32)
    p2 = r2.astype(jnp.bfloat16)
    return jnp.concatenate([p0, p1, p2], axis=1)  # (V, 3*D) bf16


def _embed_onehot(idx, weight, *, tm, vmem_limit):
    v, d = weight.shape
    v_pad = _round_up(v, 8)
    n = idx.shape[0]
    tm_eff = _round_up(min(tm, max(n, 8)), 8)
    n_pad = _round_up(n, tm_eff)
    num_chunks = n_pad // tm_eff

    idx_p = jnp.zeros((n_pad, 1), jnp.int32).at[:n, 0].set(idx)  # pad rows -> row 0 (discarded)

    # TODO(synk): cache the padded bf16 planes across calls (weights are static between
    # optimizer steps); re-splitting per call costs one extra table read + write in HBM.
    planes = _split_bf16_planes(weight)
    if v_pad != v:
        planes = jnp.zeros((v_pad, 3 * d), jnp.bfloat16).at[:v].set(planes)

    # TODO(synk): pipeline_mode=pl.Buffered(1) on the constant table block would halve
    # its VMEM footprint; kept default-buffered for lowering safety and accounted for
    # in the per-generation vocab caps instead.
    out = pl.pallas_call(
        _onehot_kernel,
        out_shape=jax.ShapeDtypeStruct((n_pad, d), weight.dtype),
        grid=(num_chunks,),
        in_specs=[
            pl.BlockSpec((tm_eff, 1), lambda c: (c, 0)),        # per-chunk indices
            pl.BlockSpec((v_pad, 3 * d), lambda c: (0, 0)),     # resident plane table
        ],
        out_specs=pl.BlockSpec((tm_eff, d), lambda c: (c, 0)),
        compiler_params=pltpu.CompilerParams(
            dimension_semantics=("parallel",),
            vmem_limit_bytes=vmem_limit),
    )(idx_p, planes)
    return out[:n]


# ----------------------------------------------------------------------------- #
# Path B: large vocab — table in HBM, deep-ring row DMAs directly into the output block.
# ----------------------------------------------------------------------------- #
def _make_gather_kernel(tm, d, k, nsem):
    def kernel(idx_ref, w_hbm_ref, out_ref, sems):
        # idx_ref:   SMEM (N_pad,) int32 flat row indices (scalar prefetch)
        # w_hbm_ref: (V, D) table left in HBM (memory_space=pl.ANY)
        # out_ref:   (TM//k, k*D) lane-dense pipelined output block; chunk row r lands
        #            directly at [r//k, (r%k)*D : (r%k+1)*D] -> no scratch, no extra
        #            VMEM->VMEM copy, and every byte of the block is written.
        # sems:      (nsem,) DMA semaphores -> nsem row copies in flight.
        c = pl.program_id(0)
        base = c * tm

        def dst(r):
            return out_ref.at[pl.ds(r // k, 1), pl.ds((r % k) * d, d)]

        def start_copy(r, row):
            pltpu.make_async_copy(w_hbm_ref.at[pl.ds(row, 1), :], dst(r),
                                  sems.at[r % nsem]).start()

        def wait_copy(r):
            # src address is irrelevant for a wait (only sizes + semaphore matter).
            pltpu.make_async_copy(w_hbm_ref.at[pl.ds(0, 1), :], dst(r),
                                  sems.at[r % nsem]).wait()

        # Prime the ring with nsem outstanding row DMAs (static unroll, nsem small).
        for r in range(nsem):
            start_copy(r, idx_ref[base + r])

        # Steady state over rows [0, tm - nsem): no predicate; unrolled so the LLO
        # scheduler can co-issue several starts/waits per bundle.
        def body(r, carry):
            nxt_row = idx_ref[base + r + nsem]   # SMEM read hoisted ABOVE the wait
            wait_copy(r)                         # (.wait() breaks sst->sld forwarding)
            start_copy(r + nsem, nxt_row)
            return carry

        lax.fori_loop(0, tm - nsem, body, 0, unroll=8)

        # Drain the last nsem rows (static unroll; r is a Python int -> static slices).
        for r in range(tm - nsem, tm):
            wait_copy(r)

    return kernel


def _embed_gather(idx, weight, *, tm, nsem):
    v, d = weight.shape
    n = idx.shape[0]
    # Lane packing: when D divides 128, pack k = 128 // D consecutive flattened
    # (batch*field) rows into one 128-lane output row. Row-major (N//k, k*D) has the
    # same memory layout as (N, D), so the final reshape is free, the out block is
    # lane-dense, and there is zero output write amplification.
    k = 128 // d if 128 % d == 0 else 1
    # TODO(synk): generalize to k = 128 // gcd(D, 128) for D that neither divides nor
    # is a multiple of 128 (currently falls back to k=1 full-D-wide blocks, which is
    # still amplification-free since D equals the full array dim).
    row_group = 8 * k                        # block rows (tm//k) must be a multiple of 8
    tm_eff = _round_up(min(tm, max(n, row_group)), row_group)
    n_pad = _round_up(n, tm_eff)
    num_chunks = n_pad // tm_eff
    nsem_eff = min(nsem, tm_eff)

    idx_p = jnp.zeros((n_pad,), jnp.int32).at[:n].set(idx)   # pad rows gather row 0, discarded
    kernel = _make_gather_kernel(tm_eff, d, k, nsem_eff)

    # TODO(synk): at very large batch*fields (>~256K rows) stage per-chunk indices into
    # an SMEM scratch instead of scalar-prefetching the whole flat index array
    # (1-D SMEM pads to next_pow2(4*N_pad) bytes).
    grid_spec = pltpu.PrefetchScalarGridSpec(
        num_scalar_prefetch=1,                                # flat indices -> SMEM
        grid=(num_chunks,),
        in_specs=[pl.BlockSpec(memory_space=pl.ANY)],         # table stays in HBM
        out_specs=pl.BlockSpec((tm_eff // k, k * d), lambda c, idx_ref: (c, 0)),
        scratch_shapes=[pltpu.SemaphoreType.DMA((nsem_eff,))],
    )
    out_packed = pl.pallas_call(
        kernel,
        out_shape=jax.ShapeDtypeStruct((n_pad // k, k * d), weight.dtype),
        grid_spec=grid_spec,
        compiler_params=pltpu.CompilerParams(dimension_semantics=("parallel",)),
    )(idx_p, weight)
    return out_packed.reshape(n_pad, d)[:n]


# ----------------------------------------------------------------------------- #
# Public wrapper (== FeaturesEmbedding.forward)
# ----------------------------------------------------------------------------- #
def features_embedding(x, offsets, weight, *, path="auto", tm_gather=2048,
                       tm_onehot=256, nsem=32):
    """x: (B, F) int32, offsets: (F,) int32, weight: (V, D) f32 -> (B, F, D) f32."""
    b, f = x.shape
    v, d = weight.shape
    # Offset shift + flatten fused on the XLA side; kernels only see flat row ids.
    idx = (x.astype(jnp.int32) + offsets.astype(jnp.int32)[None, :]).reshape(-1)

    v_cap, vmem_limit = _GEN_PARAMS[_device_generation()]
    if path == "auto":
        path = "onehot" if _round_up(v, 8) <= v_cap else "gather"

    if path == "onehot":
        out = _embed_onehot(idx, weight, tm=tm_onehot, vmem_limit=vmem_limit)
    elif path == "gather":
        out = _embed_gather(idx, weight, tm=tm_gather, nsem=nsem)
    else:
        raise ValueError(f"unknown path: {path}")
    return out.reshape(b, f, d)


# ----------------------------------------------------------------------------- #
# Self-test
# ----------------------------------------------------------------------------- #
if __name__ == "__main__":
    def make_inputs(key, field_dims, embed_dim, batch):
        total = int(sum(field_dims))
        k_w, k_x = jax.random.split(key)
        # nn.init.xavier_uniform_ on the (total, embed_dim) embedding weight.
        limit = float(np.sqrt(6.0 / (total + embed_dim)))
        weight = jax.random.uniform(k_w, (total, embed_dim), dtype=jnp.float32,
                                    minval=-limit, maxval=limit)
        # offsets = (0, cumsum(field_dims)[:-1])
        offsets = jnp.asarray(np.array((0, *np.cumsum(field_dims)[:-1]), dtype=np.int32))
        # 0 <= x[:, j] < field_dims[j]
        maxvals = jnp.asarray(field_dims, dtype=jnp.int32)[None, :]
        x = jax.random.randint(k_x, (batch, len(field_dims)), 0, maxvals, dtype=jnp.int32)
        return x, offsets, weight

    key = jax.random.PRNGKey(0)
    k1, k2 = jax.random.split(key)

    configs = [
        # (field_dims, embed_dim, batch, key)
        ((3, 4, 5, 6), 32, 2, k1),                 # tiny: 4 fields, vocab 18, 8 rows
        (tuple(range(5, 31)), 32, 64, k2),          # 26 fields, vocab 455, 1664 rows
    ]

    for field_dims, embed_dim, batch, k in configs:
        x, offsets, weight = make_inputs(k, field_dims, embed_dim, batch)
        # Pure-numpy reference of the PyTorch forward pass.
        ref = np.asarray(weight)[np.asarray(x) + np.asarray(offsets)[None, :]]
        for path in ("onehot", "gather", "auto"):
            out = jax.block_until_ready(features_embedding(x, offsets, weight, path=path))
            assert out.shape == (batch, len(field_dims), embed_dim)
            np.testing.assert_allclose(np.asarray(out), ref, rtol=1e-6, atol=1e-6)

    print("KERNEL_OK")
</pallas_src>

<mosaic_0001>
module attributes {stable_mosaic.version = 11 : i64} {
  func.func @_onehot_kernel(%arg0: i32, %arg1: memref<8x1xi32, #tpu.memory_space<vmem>>, %arg2: memref<24x96xbf16, #tpu.memory_space<vmem>>, %arg3: memref<8x32xf32, #tpu.memory_space<vmem>>) attributes {dimension_semantics = [#tpu.dimension_semantics<parallel>], iteration_bounds = array<i64: 1>, scalar_prefetch = 0 : i64, scratch_operands = 0 : i64, tpu.core_type = #tpu.core_type<tc>, window_params = [{transform_indices = @transform_0, window_bounds = array<i64: 8, 1>}, {pipeline_mode = #tpu.pipeline_mode<synchronous>, transform_indices = @transform_1, window_bounds = array<i64: 24, 96>}, {transform_indices = @transform_2, window_bounds = array<i64: 8, 32>}]} {
    %c0 = arith.constant 0 : index
    %c0_0 = arith.constant 0 : index
    %0 = vector.load %arg1[%c0, %c0_0] : memref<8x1xi32, #tpu.memory_space<vmem>>, vector<8x1xi32>
    %1 = tpu.iota {dimensions = array<i32: 1>} : vector<8x24xi32>
    %2 = vector.broadcast %0 : vector<8x1xi32> to vector<8x24xi32>
    %3 = arith.cmpi eq, %2, %1 : vector<8x24xi32>
    %4 = arith.extui %3 : vector<8x24xi1> to vector<8x24xi32>
    %5 = arith.sitofp %4 : vector<8x24xi32> to vector<8x24xf32>
    %6 = arith.truncf %5 : vector<8x24xf32> to vector<8x24xbf16>
    %c0_1 = arith.constant 0 : index
    %c0_2 = arith.constant 0 : index
    %7 = vector.load %arg2[%c0_1, %c0_2] : memref<24x96xbf16, #tpu.memory_space<vmem>>, vector<24x96xbf16>
    %cst = arith.constant dense<0.000000e+00> : vector<8x96xf32>
    %8 = tpu.matmul %6, %7, %cst {dimension_numbers = #tpu.dot_dimension_numbers<[1], [0], [0], [1], [0, 0, 1, 1], [], []>} : vector<8x24xbf16>, vector<24x96xbf16>, vector<8x96xf32> -> vector<8x96xf32>
    %9 = vector.extract_strided_slice %8 {offsets = [0, 0], sizes = [8, 32], strides = [1, 1]} : vector<8x96xf32> to vector<8x32xf32>
    %10 = vector.extract_strided_slice %8 {offsets = [0, 32], sizes = [8, 32], strides = [1, 1]} : vector<8x96xf32> to vector<8x32xf32>
    %11 = arith.addf %9, %10 : vector<8x32xf32>
    %12 = vector.extract_strided_slice %8 {offsets = [0, 64], sizes = [8, 32], strides = [1, 1]} : vector<8x96xf32> to vector<8x32xf32>
    %13 = arith.addf %11, %12 : vector<8x32xf32>
    %c0_3 = arith.constant 0 : index
    %c0_4 = arith.constant 0 : index
    %14 = vector.load %arg3[%c0_3, %c0_4] : memref<8x32xf32, #tpu.memory_space<vmem>>, vector<8x32xf32>
    tpu.vector_store %arg3[%c0_3, %c0_4], %13 {strides = array<i32>} : memref<8x32xf32, #tpu.memory_space<vmem>>, vector<8x32xf32>,
    return
  }
  func.func @transform_0(%arg0: i32) -> (i32, i32) {
    %c0_i32 = arith.constant 0 : i32
    %c0_i32_0 = arith.constant 0 : i32
    return %arg0, %c0_i32 : i32, i32
  }
  func.func @transform_1(%arg0: i32) -> (i32, i32) {
    %c0_i32 = arith.constant 0 : i32
    %c0_i32_0 = arith.constant 0 : i32
    %c0_i32_1 = arith.constant 0 : i32
    return %c0_i32, %c0_i32_0 : i32, i32
  }
  func.func @transform_2(%arg0: i32) -> (i32, i32) {
    %c0_i32 = arith.constant 0 : i32
    %c0_i32_0 = arith.constant 0 : i32
    return %arg0, %c0_i32 : i32, i32
  }
}

</mosaic_0001>

<bundles_post_ra>
// kernel: tpu_custom_call.1
= control target key start
LH: loop header
LB: loop body
LE: loop exit
PB: predicated region body
PF: predicated region fallthrough
CT: control target
= control target key end

     0   :  { %7 = vsyncpa [#allocation3], 0  ;;  %s225_s0 = inlined_call_operand.vmem [shape: s32[8,1], index: 0, kind: input, shape index: {}]   ;;  %s226_s1 = inlined_call_operand.hbm [shape: bf16[24,96], index: 1, kind: input, shape index: {}]   ;;  %s227_s2 = inlined_call_operand.hbm [shape: f32[8,32], index: 2, kind: output, shape index: {}]  }
   0x1   :  { %8 = vsyncpa [#allocation4], 0  ;;  %s193_s9 = smov [#allocation2]  }
   0x2   :  { %s16_s10 = sshll.u32 %s193_s9, 4  ;;  %s17_s10 = int_to_ptr.vmem [resolvable:$true] %s16_s10 }
   0x3   :  { %s157_s11 = scalar_lea.vmem %s17_s10, 192  ;;  %p162_p1 = scmp.lt.s32.totalorder %s17_s10, %s17_s10 }
   0x4   :  { %p158_p0 = scmp.ne.s32.totalorder %s17_s10, %s157_s11  ;;  %p163_p2 = scmp.lt.s32.totalorder %s157_s11, %s157_s11 }
   0x6   :  { %p164_p3 = por %p163_p2, %p162_p1 }
   0x8   :  { %p165_p4 = pnand %p164_p3, %p158_p0 }
   0xa   :  { %168 = shalt.err (!%p165_p4)
}
   0xb   :  { %s194_s12 = smov 64   ;;  %s195_s13 = smov 4  }
   0xc   :  { %22 = dma.hbm_to_vmem [thread:$0]  %s226_s1, 192, %s17_s10, [#allocation3], %s194_s12, %s194_s12, %s195_s13  }
   0xd   :  { %189 = dma.done.wait [#allocation3], 192  }
   0xe   :  { %190 = vsyncadd [#allocation3], 4294967104  ;;  %v196_v0 = vmov 0   ;;  %v197_v1 = vmov 0.0   ;;  %vm53_vm0 = vcmask 1043456   ;;  %v27_v2 = vld [vmem:[%s225_s0] sm:$0xff]  ;;  %v28_v6 = vlaneseq }
   0xf   :  { %146 = vset.pattern.permute.xlu0 %v196_v0  ;;  %130 = vmatprep.subr.bf16.mxu0 %v197_v1  ;;  %v147_v3 = vld [vmem:[#allocation2 + $0x8] ss:$0 sps:$4 sm:$0xff]   ;;  %vm198_vm1 = vmmov 0   ;;  %v148_v5 = vld [vmem:[#allocation2] sm:$0xff]   ;;  %vm49_vm3 = vcmask 195584   ;;  %s199_s0 = smov 96  }
  0x10   :  { %134 = vmatprep.mubr.msk.bf16.mxu0 %vm198_vm1, %v197_v1  ;;  %31 = vperm.xlu0 %146, %v27_v2   ;;  %v55_v4 = vsel %vm53_vm0, %v147_v3, 0  ;;  %v29_v7 = vand.u32 127, %v28_v6  ;;  %s200_s1 = smov [#allocation5]   ;;  %vm106_vm4 = vcmask 261120  }
  0x11   :  { %131 = vmatpush3.bf16.msra.mxu0 %v55_v4  ;;  %s114_s18 = sshll.u32 %s200_s1, 4  ;;  %s115_s18 = int_to_ptr.vmem [resolvable:$true] %s114_s18 }
  0x12   :  { %132 = vmatprep.subr.bf16.mxu0 %v197_v1  ;;  %s169_s19 = scalar_lea.vmem %s115_s18, 128  ;;  %p174_p6 = scmp.lt.s32.totalorder %s115_s18, %s115_s18 }
  0x13   :  { %p170_p5 = scmp.ne.s32.totalorder %s115_s18, %s169_s19  ;;  %p175_p7 = scmp.lt.s32.totalorder %s169_s19, %s169_s19 }
  0x15   :  { %133 = vmatpush3.bf16.msra.mxu0 %v148_v5  ;;  %p176_p8 = por %p175_p7, %p174_p6 }
  0x17   :  { %p177_p9 = pnand %p176_p8, %p170_p5 }
  0x8b   :  { %v32_v8 = vpop.permute.xlu0 %31 }
  0x8c   :  { %vm33_vm2 = vcmp.eq.s32.totalorder %v32_v8, %v29_v7 }
  0x8d   :  { %v123_v9 = vsel %vm33_vm2, 1.0, %v197_v1 }
  0x8e   :  { %v36_v10 = vpack.c.bf16 %v123_v9, %v123_v9 }
  0x90   :  { %135 = vmatmul.mubr.msk.bf16.vlgmr.msra.gmra.mxu0 %vm49_vm3, %v36_v10 }
 0x150   :  { %v91_v11 = vpop.f32.mrf.mxu0 }
 0x151   :  { %102 = vrot.lane.b32.xlu1 %v91_v11, %s194_s12  ;;  %98 = vrot.lane.b32.xlu0 %v91_v11, %s199_s0 }
 0x152   :  { %v136_v12 = vpop.f32.mrf.mxu0 }
 0x154   :  { %v94_v13 = vpop.f32.mrf.mxu0 }
 0x156   :  { %v137_v14 = vpop.f32.mrf.mxu0 }
 0x1c3   :  { %v99_v15 = vpop.permute.xlu0 %98  ;;  %v103_v17 = vpop.permute.xlu1 %102 }
 0x1c4   :  { %v101_v16 = vadd.f32 %v99_v15, %v91_v11 }
 0x1c6   :  { %v105_v18 = vadd.f32 %v103_v17, %v101_v16 }
 0x1c8   :  { %107 = vst.msk [vmem:[#allocation5] sm:$0xff] %vm106_vm4, %v105_v18 }
 0x1c9   :  { %180 = shalt.err (!%p177_p9)
}
 0x1ca   :  { %117 = dma.vmem_to_hbm [thread:$0]  %s115_s18, 128, %s227_s2, [#allocation4]  }
 0x1cb   :  { %191 = dma.done.wait [#allocation4], 128  }
 0x1cc   :  { %192 = vsyncadd [#allocation4], 4294967168 }
 0x1cd   :  { %121 = vsyncpa [#allocation3], 1 }
 0x1ce   :  { %122 = vsyncpa [#allocation4], 1 }

</bundles_post_ra>
